<compile_context>
chip_gen: v6e
topology: v6e:2x2x1
jax: 0.10.0
libtpu: 0.0.40
codegen_flags: <defaults>
</compile_context>

<pallas_src>
import jax
import jax.numpy as jnp
from jax import lax
from jax.experimental import pallas as pl
from jax.experimental.pallas import tpu as pltpu


def _shifted_cat_conv(y, w_ref):
    """3x3 'SAME' conv of one image in (H, W*Cin) lane-flattened layout.

    y:     (H, W*Cin) float32 activation (already BN-affine'd; border pad = 0).
    w_ref: (3*W*Cin, W*Cout) bf16 banded weights (dw taps + W zero-padding
           folded in by `build_banded_weight`).
    Returns (H, W*Cout) float32.
    """
    H, WC = y.shape
    zrow = jnp.zeros((1, WC), y.dtype)
    y_up = jnp.concatenate([zrow, y[:H - 1]], axis=0)   # rows h-1 (zero at top)
    y_dn = jnp.concatenate([y[1:], zrow], axis=0)       # rows h+1 (zero at bottom)
    ycat = jnp.concatenate([y_up, y, y_dn], axis=1)     # (H, 3*W*Cin)
    return jnp.dot(ycat.astype(jnp.bfloat16), w_ref[...],
                   preferred_element_type=jnp.float32)


def conv_block_kernel(x_ref, s1_ref, b1_ref, w1_ref, s2_ref, b2_ref, w2_ref,
                      out_ref):
    """Fused BN -> conv3x3 -> ReLU -> BN -> conv3x3 -> ReLU for one image."""
    x = x_ref[0]                                         # (H, W*Cin) f32
    y = x * s1_ref[...] + b1_ref[...]                    # BN1 (lane dense)
    h = jnp.maximum(_shifted_cat_conv(y, w1_ref), 0.0)   # conv1 + ReLU
    h = h * s2_ref[...] + b2_ref[...]                    # BN2
    out_ref[0] = jnp.maximum(_shifted_cat_conv(h, w2_ref), 0.0)  # conv2 + ReLU


def build_banded_weight(w_hwio, W):
    """(3, 3, Cin, Cout) HWIO -> (3*W*Cin, W*Cout) banded matrix.

    Row index = dh*W*Cin + w_in*Cin + ci, col index = w_out*Cout + co;
    entry = w[dh, w_in - w_out + 1, ci, co] when |w_in - w_out| <= 1, else 0.
    The band implements the dw taps and the W-direction zero padding of a
    'SAME' 3x3 conv directly on the lane-flattened (H, W*C) layout.
    """
    _, _, Cin, Cout = w_hwio.shape
    dw = jnp.arange(W)[:, None] - jnp.arange(W)[None, :] + 1      # (W_in, W_out)
    valid = (dw >= 0) & (dw <= 2)
    blocks = w_hwio[:, jnp.clip(dw, 0, 2)]                        # (3,W,W,Cin,Cout)
    blocks = blocks * valid[None, :, :, None, None]
    blocks = jnp.transpose(blocks, (0, 1, 3, 2, 4))               # (3,W_in,Cin,W_out,Cout)
    return blocks.reshape(3 * W * Cin, W * Cout)


@jax.jit
def conv_block(x_nchw, s1, b1, w1, s2, b2, w2):
    """x_nchw: (N, Cin, H, W) float32.  Returns (N, Cout, H, W) float32."""
    N, Cin, H, W = x_nchw.shape
    Cout = w1.shape[-1]

    # NCHW -> (N, H, W*Cin): channels fastest, so lane index = w*Cin + ci.
    x = jnp.transpose(x_nchw, (0, 2, 3, 1)).reshape(N, H, W * Cin)

    # Per-channel BN affine, tiled over W so it broadcasts on the lane axis.
    s1_t = jnp.tile(s1.reshape(Cin), W).reshape(1, W * Cin)
    b1_t = jnp.tile(b1.reshape(Cin), W).reshape(1, W * Cin)
    s2_t = jnp.tile(s2.reshape(Cout), W).reshape(1, W * Cout)
    b2_t = jnp.tile(b2.reshape(Cout), W).reshape(1, W * Cout)

    # Banded conv weights (dw taps + W zero padding folded in), bf16 for MXU.
    w1_b = build_banded_weight(w1, W).astype(jnp.bfloat16)   # (3*W*Cin,  W*Cout)
    w2_b = build_banded_weight(w2, W).astype(jnp.bfloat16)   # (3*W*Cout, W*Cout)

    flops = 2 * N * H * W * 9 * (Cin * Cout + Cout * Cout)
    bytes_accessed = ((x.size + N * H * W * Cout) * 4
                      + (w1_b.size + w2_b.size) * 2
                      + (s1_t.size + b1_t.size + s2_t.size + b2_t.size) * 4)

    out = pl.pallas_call(
        conv_block_kernel,
        out_shape=jax.ShapeDtypeStruct((N, H, W * Cout), jnp.float32),
        grid=(N,),
        in_specs=[
            pl.BlockSpec((1, H, W * Cin), lambda n: (n, 0, 0)),        # x
            pl.BlockSpec((1, W * Cin), lambda n: (0, 0)),              # bn1 scale
            pl.BlockSpec((1, W * Cin), lambda n: (0, 0)),              # bn1 shift
            pl.BlockSpec((3 * W * Cin, W * Cout), lambda n: (0, 0)),   # conv1 W
            pl.BlockSpec((1, W * Cout), lambda n: (0, 0)),             # bn2 scale
            pl.BlockSpec((1, W * Cout), lambda n: (0, 0)),             # bn2 shift
            pl.BlockSpec((3 * W * Cout, W * Cout), lambda n: (0, 0)),  # conv2 W
        ],
        out_specs=pl.BlockSpec((1, H, W * Cout), lambda n: (n, 0, 0)),
        compiler_params=pltpu.CompilerParams(
            dimension_semantics=("parallel",)),
        cost_estimate=pl.CostEstimate(flops=flops, transcendentals=0,
                                      bytes_accessed=bytes_accessed),
    )(x, s1_t, b1_t, w1_b, s2_t, b2_t, w2_b)

    # (N, H, W*Cout) -> NCHW
    return jnp.transpose(out.reshape(N, H, W, Cout), (0, 3, 1, 2))


def reference(x_nchw, s1, b1, w1, s2, b2, w2):
    """Pure-JAX f32 reference (same math, XLA conv, HIGHEST precision)."""
    x = jnp.transpose(x_nchw, (0, 2, 3, 1))
    y = x * s1 + b1
    y = lax.conv_general_dilated(y, w1, (1, 1), "SAME",
                                 dimension_numbers=("NHWC", "HWIO", "NHWC"),
                                 precision=lax.Precision.HIGHEST)
    y = jnp.maximum(y, 0.0)
    y = y * s2 + b2
    y = lax.conv_general_dilated(y, w2, (1, 1), "SAME",
                                 dimension_numbers=("NHWC", "HWIO", "NHWC"),
                                 precision=lax.Precision.HIGHEST)
    y = jnp.maximum(y, 0.0)
    return jnp.transpose(y, (0, 3, 1, 2))


def make_params(key, cin, cout, eps=1e-5):
    ks = jax.random.split(key, 10)
    # BatchNorm2d(cin): gamma, beta, running_mean, running_var
    g1 = jax.random.uniform(ks[0], (cin,), jnp.float32, 0.5, 1.5)
    be1 = 0.1 * jax.random.normal(ks[1], (cin,), jnp.float32)
    m1 = 0.1 * jax.random.normal(ks[2], (cin,), jnp.float32)
    v1 = jax.random.uniform(ks[3], (cin,), jnp.float32, 0.5, 1.5)
    # BatchNorm2d(cout)
    g2 = jax.random.uniform(ks[4], (cout,), jnp.float32, 0.5, 1.5)
    be2 = 0.1 * jax.random.normal(ks[5], (cout,), jnp.float32)
    m2 = 0.1 * jax.random.normal(ks[6], (cout,), jnp.float32)
    v2 = jax.random.uniform(ks[7], (cout,), jnp.float32, 0.5, 1.5)
    # Conv weights, HWIO
    w1 = 0.1 * jax.random.normal(ks[8], (3, 3, cin, cout), jnp.float32)
    w2 = 0.1 * jax.random.normal(ks[9], (3, 3, cout, cout), jnp.float32)
    # Fold BN running stats into per-channel scale/shift (inference mode).
    s1 = (g1 / jnp.sqrt(v1 + eps)).reshape(1, 1, 1, cin)
    b1 = (be1 - m1 * g1 / jnp.sqrt(v1 + eps)).reshape(1, 1, 1, cin)
    s2 = (g2 / jnp.sqrt(v2 + eps)).reshape(1, 1, 1, cout)
    b2 = (be2 - m2 * g2 / jnp.sqrt(v2 + eps)).reshape(1, 1, 1, cout)
    return s1, b1, w1, s2, b2, w2


if __name__ == "__main__":
    # Deterministic small example: in_depth == out_depth == 8, 16x16 spatial
    # (W * C = 128 -> fully lane-dense layout inside the kernel).
    N, Cin, Cout, H, W = 2, 8, 8, 16, 16
    key = jax.random.PRNGKey(0)
    kx, kp = jax.random.split(key)
    x = jax.random.normal(kx, (N, Cin, H, W), jnp.float32)   # NCHW, like PyTorch
    params = make_params(kp, Cin, Cout)

    out = conv_block(x, *params)
    out = jax.block_until_ready(out)

    ref = reference(x, *params)
    assert out.shape == (N, Cout, H, W)
    # Tolerance reflects single-pass bf16 MXU (f32 accumulation) vs f32 reference.
    assert jnp.allclose(out, ref, rtol=3e-2, atol=3e-2), (
        float(jnp.max(jnp.abs(out - ref))))
    print("KERNEL_OK")
</pallas_src>

<mosaic_0001>
module attributes {stable_mosaic.version = 11 : i64} {
  func.func @conv_block_kernel(%arg0: i32, %arg1: memref<1x16x128xf32, #tpu.memory_space<vmem>>, %arg2: memref<1x128xf32, #tpu.memory_space<vmem>>, %arg3: memref<1x128xf32, #tpu.memory_space<vmem>>, %arg4: memref<384x128xbf16, #tpu.memory_space<vmem>>, %arg5: memref<1x128xf32, #tpu.memory_space<vmem>>, %arg6: memref<1x128xf32, #tpu.memory_space<vmem>>, %arg7: memref<384x128xbf16, #tpu.memory_space<vmem>>, %arg8: memref<1x16x128xf32, #tpu.memory_space<vmem>>) attributes {dimension_semantics = [#tpu.dimension_semantics<parallel>], iteration_bounds = array<i64: 2>, scalar_prefetch = 0 : i64, scratch_operands = 0 : i64, tpu.core_type = #tpu.core_type<tc>, window_params = [{transform_indices = @transform_0, window_bounds = array<i64: 1, 16, 128>}, {pipeline_mode = #tpu.pipeline_mode<synchronous>, transform_indices = @transform_1, window_bounds = array<i64: 1, 128>}, {pipeline_mode = #tpu.pipeline_mode<synchronous>, transform_indices = @transform_2, window_bounds = array<i64: 1, 128>}, {pipeline_mode = #tpu.pipeline_mode<synchronous>, transform_indices = @transform_3, window_bounds = array<i64: 384, 128>}, {pipeline_mode = #tpu.pipeline_mode<synchronous>, transform_indices = @transform_4, window_bounds = array<i64: 1, 128>}, {pipeline_mode = #tpu.pipeline_mode<synchronous>, transform_indices = @transform_5, window_bounds = array<i64: 1, 128>}, {pipeline_mode = #tpu.pipeline_mode<synchronous>, transform_indices = @transform_6, window_bounds = array<i64: 384, 128>}, {transform_indices = @transform_7, window_bounds = array<i64: 1, 16, 128>}]} {
    %c0 = arith.constant 0 : index
    %c0_0 = arith.constant 0 : index
    %c0_1 = arith.constant 0 : index
    %0 = vector.load %arg1[%c0, %c0_0, %c0_1] : memref<1x16x128xf32, #tpu.memory_space<vmem>>, vector<1x16x128xf32>
    %1 = vector.shape_cast %0 : vector<1x16x128xf32> to vector<16x128xf32>
    %c0_2 = arith.constant 0 : index
    %c0_3 = arith.constant 0 : index
    %2 = vector.load %arg2[%c0_2, %c0_3] : memref<1x128xf32, #tpu.memory_space<vmem>>, vector<1x128xf32>
    %3 = vector.broadcast %2 : vector<1x128xf32> to vector<16x128xf32>
    %4 = arith.mulf %1, %3 : vector<16x128xf32>
    %c0_4 = arith.constant 0 : index
    %c0_5 = arith.constant 0 : index
    %5 = vector.load %arg3[%c0_4, %c0_5] : memref<1x128xf32, #tpu.memory_space<vmem>>, vector<1x128xf32>
    %6 = vector.broadcast %5 : vector<1x128xf32> to vector<16x128xf32>
    %7 = arith.addf %4, %6 : vector<16x128xf32>
    %cst = arith.constant 0.000000e+00 : f32
    %8 = vector.broadcast %cst : f32 to vector<1x128xf32>
    %9 = vector.extract_strided_slice %7 {offsets = [0, 0], sizes = [15, 128], strides = [1, 1]} : vector<16x128xf32> to vector<15x128xf32>
    %10 = tpu.concatenate %8, %9 in 0 : vector<1x128xf32>, vector<15x128xf32> -> vector<16x128xf32>
    %11 = vector.extract_strided_slice %7 {offsets = [1, 0], sizes = [15, 128], strides = [1, 1]} : vector<16x128xf32> to vector<15x128xf32>
    %12 = tpu.concatenate %11, %8 in 0 : vector<15x128xf32>, vector<1x128xf32> -> vector<16x128xf32>
    %13 = tpu.concatenate %10, %7, %12 in 1 : vector<16x128xf32>, vector<16x128xf32>, vector<16x128xf32> -> vector<16x384xf32>
    %14 = arith.truncf %13 : vector<16x384xf32> to vector<16x384xbf16>
    %c0_6 = arith.constant 0 : index
    %c0_7 = arith.constant 0 : index
    %15 = vector.load %arg4[%c0_6, %c0_7] : memref<384x128xbf16, #tpu.memory_space<vmem>>, vector<384x128xbf16>
    %cst_8 = arith.constant dense<0.000000e+00> : vector<16x128xf32>
    %16 = tpu.matmul %14, %15, %cst_8 {dimension_numbers = #tpu.dot_dimension_numbers<[1], [0], [0], [1], [0, 0, 1, 1], [], []>} : vector<16x384xbf16>, vector<384x128xbf16>, vector<16x128xf32> -> vector<16x128xf32>
    %cst_9 = arith.constant 0.000000e+00 : f32
    %17 = vector.broadcast %cst_9 : f32 to vector<16x128xf32>
    %18 = arith.maximumf %16, %17 : vector<16x128xf32>
    %c0_10 = arith.constant 0 : index
    %c0_11 = arith.constant 0 : index
    %19 = vector.load %arg5[%c0_10, %c0_11] : memref<1x128xf32, #tpu.memory_space<vmem>>, vector<1x128xf32>
    %20 = vector.broadcast %19 : vector<1x128xf32> to vector<16x128xf32>
    %21 = arith.mulf %18, %20 : vector<16x128xf32>
    %c0_12 = arith.constant 0 : index
    %c0_13 = arith.constant 0 : index
    %22 = vector.load %arg6[%c0_12, %c0_13] : memref<1x128xf32, #tpu.memory_space<vmem>>, vector<1x128xf32>
    %23 = vector.broadcast %22 : vector<1x128xf32> to vector<16x128xf32>
    %24 = arith.addf %21, %23 : vector<16x128xf32>
    %cst_14 = arith.constant 0.000000e+00 : f32
    %25 = vector.broadcast %cst_14 : f32 to vector<1x128xf32>
    %26 = vector.extract_strided_slice %24 {offsets = [0, 0], sizes = [15, 128], strides = [1, 1]} : vector<16x128xf32> to vector<15x128xf32>
    %27 = tpu.concatenate %25, %26 in 0 : vector<1x128xf32>, vector<15x128xf32> -> vector<16x128xf32>
    %28 = vector.extract_strided_slice %24 {offsets = [1, 0], sizes = [15, 128], strides = [1, 1]} : vector<16x128xf32> to vector<15x128xf32>
    %29 = tpu.concatenate %28, %25 in 0 : vector<15x128xf32>, vector<1x128xf32> -> vector<16x128xf32>
    %30 = tpu.concatenate %27, %24, %29 in 1 : vector<16x128xf32>, vector<16x128xf32>, vector<16x128xf32> -> vector<16x384xf32>
    %31 = arith.truncf %30 : vector<16x384xf32> to vector<16x384xbf16>
    %c0_15 = arith.constant 0 : index
    %c0_16 = arith.constant 0 : index
    %32 = vector.load %arg7[%c0_15, %c0_16] : memref<384x128xbf16, #tpu.memory_space<vmem>>, vector<384x128xbf16>
    %cst_17 = arith.constant dense<0.000000e+00> : vector<16x128xf32>
    %33 = tpu.matmul %31, %32, %cst_17 {dimension_numbers = #tpu.dot_dimension_numbers<[1], [0], [0], [1], [0, 0, 1, 1], [], []>} : vector<16x384xbf16>, vector<384x128xbf16>, vector<16x128xf32> -> vector<16x128xf32>
    %cst_18 = arith.constant 0.000000e+00 : f32
    %34 = vector.broadcast %cst_18 : f32 to vector<16x128xf32>
    %35 = arith.maximumf %33, %34 : vector<16x128xf32>
    %c0_19 = arith.constant 0 : index
    %c0_20 = arith.constant 0 : index
    %c0_21 = arith.constant 0 : index
    %36 = vector.load %arg8[%c0_19, %c0_20, %c0_21] : memref<1x16x128xf32, #tpu.memory_space<vmem>>, vector<1x16x128xf32>
    %37 = vector.shape_cast %36 : vector<1x16x128xf32> to vector<16x128xf32>
    %38 = vector.shape_cast %35 : vector<16x128xf32> to vector<1x16x128xf32>
    tpu.vector_store %arg8[%c0_19, %c0_20, %c0_21], %38 {strides = array<i32>} : memref<1x16x128xf32, #tpu.memory_space<vmem>>, vector<1x16x128xf32>,
    return
  }
  func.func @transform_0(%arg0: i32) -> (i32, i32, i32) {
    %c0_i32 = arith.constant 0 : i32
    %c0_i32_0 = arith.constant 0 : i32
    %c0_i32_1 = arith.constant 0 : i32
    return %arg0, %c0_i32, %c0_i32_0 : i32, i32, i32
  }
  func.func @transform_1(%arg0: i32) -> (i32, i32) {
    %c0_i32 = arith.constant 0 : i32
    %c0_i32_0 = arith.constant 0 : i32
    %c0_i32_1 = arith.constant 0 : i32
    return %c0_i32, %c0_i32_0 : i32, i32
  }
  func.func @transform_2(%arg0: i32) -> (i32, i32) {
    %c0_i32 = arith.constant 0 : i32
    %c0_i32_0 = arith.constant 0 : i32
    %c0_i32_1 = arith.constant 0 : i32
    return %c0_i32, %c0_i32_0 : i32, i32
  }
  func.func @transform_3(%arg0: i32) -> (i32, i32) {
    %c0_i32 = arith.constant 0 : i32
    %c0_i32_0 = arith.constant 0 : i32
    %c0_i32_1 = arith.constant 0 : i32
    return %c0_i32, %c0_i32_0 : i32, i32
  }
  func.func @transform_4(%arg0: i32) -> (i32, i32) {
    %c0_i32 = arith.constant 0 : i32
    %c0_i32_0 = arith.constant 0 : i32
    %c0_i32_1 = arith.constant 0 : i32
    return %c0_i32, %c0_i32_0 : i32, i32
  }
  func.func @transform_5(%arg0: i32) -> (i32, i32) {
    %c0_i32 = arith.constant 0 : i32
    %c0_i32_0 = arith.constant 0 : i32
    %c0_i32_1 = arith.constant 0 : i32
    return %c0_i32, %c0_i32_0 : i32, i32
  }
  func.func @transform_6(%arg0: i32) -> (i32, i32) {
    %c0_i32 = arith.constant 0 : i32
    %c0_i32_0 = arith.constant 0 : i32
    %c0_i32_1 = arith.constant 0 : i32
    return %c0_i32, %c0_i32_0 : i32, i32
  }
  func.func @transform_7(%arg0: i32) -> (i32, i32, i32) {
    %c0_i32 = arith.constant 0 : i32
    %c0_i32_0 = arith.constant 0 : i32
    %c0_i32_1 = arith.constant 0 : i32
    return %arg0, %c0_i32, %c0_i32_0 : i32, i32, i32
  }
}

</mosaic_0001>

<bundles_post_ra>
// kernel: tile.18
= control target key start
LH: loop header
LB: loop body
LE: loop exit
PB: predicated region body
PF: predicated region fallthrough
CT: control target
= control target key end

     0   :  { %s28_s0 = inlined_call_operand.vmem [shape: f32[8], index: 0, kind: input, shape index: {}]   ;;  %s29_s1 = inlined_call_operand.vmem [shape: f32[16,8], index: 1, kind: output, shape index: {}]  }
   0x1   :  { %v4_v0 = vld [vmem:[%s28_s0] ss:$0 sm:$0xff] }
   0x2   :  { %5 = vst [vmem:[%s29_s1] sm:$0xff] %v4_v0  ;;  %8 = vst [vmem:[%s29_s1 + $0x8] sm:$0xff] %v4_v0 }

// kernel: tile.19
= control target key start
LH: loop header
LB: loop body
LE: loop exit
PB: predicated region body
PF: predicated region fallthrough
CT: control target
= control target key end

     0   :  { %s133_s10 = smov 120   ;;  %s134_s11 = smov 104   ;;  %vm3_vm0 = vcmask 64512   ;;  %vm9_vm1 = vcmask 1048512   ;;  %vm15_vm2 = vcmask 982912   ;;  %vm21_vm3 = vcmask 917312   ;;  %s209_s0 = inlined_call_operand.vmem [shape: f32[16,8], index: 0, kind: input, shape index: {}]   ;;  %s210_s1 = inlined_call_operand.vmem [shape: f32[1,128], index: 1, kind: output, shape index: {}]  }
   0x1   :  { %v103_v0 = vld [vmem:[%s209_s0 + $0xf] sm:$0x1]   ;;  %v105_v1 = vld [vmem:[%s209_s0 + $0xd] sm:$0x1]   ;;  %v104_v2 = vld [vmem:[%s209_s0 + $0xe] sm:$0x1]  }
   0x2   :  { %7 = vrot.lane.b32.xlu0 %v103_v0, %s133_s10  ;;  %19 = vrot.lane.b32.xlu1 %v105_v1, %s134_s11  ;;  %v106_v3 = vld [vmem:[%s209_s0 + $0xc] sm:$0x1]   ;;  %s135_s16 = smov 112   ;;  %s136_s17 = smov 96   ;;  %v107_v4 = vld [vmem:[%s209_s0 + $0xb] sm:$0x1]  }
   0x3   :  { %v108_v5 = vld [vmem:[%s209_s0 + $0xa] sm:$0x1]   ;;  %v2_v6 = vld [vmem:[%s209_s0] sm:$0x1]   ;;  %s137_s24 = smov 88   ;;  %s138_s25 = smov 80  }
   0x4   :  { %4 = vst.msk [vmem:[#allocation0] sm:$0x1] %vm3_vm0, %v2_v6   ;;  %v109_v7 = vld [vmem:[%s209_s0 + $0x9] sm:$0x1]   ;;  %v110_v8 = vld [vmem:[%s209_s0 + $0x8] sm:$0x1]  }
   0x5   :  { %s139_s30 = smov 72   ;;  %s140_s2 = smov 64   ;;  %v111_v9 = vld [vmem:[%s209_s0 + $0x7] sm:$0x1]   ;;  %v112_v10 = vld [vmem:[%s209_s0 + $0x6] sm:$0x1]  }
   0x6   :  { %13 = vrot.lane.b32.xlu0 %v104_v2, %s135_s16  ;;  %25 = vrot.lane.b32.xlu1 %v106_v3, %s136_s17  ;;  %s141_s7 = smov 56   ;;  %s142_s8 = smov 48   ;;  %v113_v11 = vld [vmem:[%s209_s0 + $0x5] sm:$0x1]   ;;  %v114_v12 = vld [vmem:[%s209_s0 + $0x4] sm:$0x1]  }
   0x7   :  { %s143_s13 = smov 40   ;;  %s144_s14 = smov 32   ;;  %v115_v13 = vld [vmem:[%s209_s0 + $0x3] sm:$0x1]   ;;  %v116_v14 = vld [vmem:[%s209_s0 + $0x2] sm:$0x1]  }
   0x8   :  { %s145_s19 = smov 24   ;;  %s146_s20 = smov 16   ;;  %v117_v15 = vld [vmem:[%s209_s0 + $0x1] sm:$0x1]   ;;  %vm27_vm4 = vcmask 851712   ;;  %vm33_vm5 = vcmask 786112  }
   0x9   :  { %s147_s0 = smov 8   ;;  %vm39_vm6 = vcmask 720512   ;;  %vm45_vm7 = vcmask 654912   ;;  %vm51_vm8 = vcmask 589312   ;;  %vm57_vm9 = vcmask 523712  }
   0xa   :  { %31 = vrot.lane.b32.xlu0 %v107_v4, %s137_s24  ;;  %37 = vrot.lane.b32.xlu1 %v108_v5, %s138_s25  ;;  %vm63_vm10 = vcmask 458112   ;;  %vm69_vm11 = vcmask 392512   ;;  %vm75_vm12 = vcmask 326912   ;;  %vm81_vm13 = vcmask 261312  }
   0xb   :  { %vm87_vm14 = vcmask 195712   ;;  %vm93_vm15 = vcmask 130112  }
   0xe   :  { %43 = vrot.lane.b32.xlu0 %v109_v7, %s139_s30  ;;  %49 = vrot.lane.b32.xlu1 %v110_v8, %s140_s2 }
  0x12   :  { %55 = vrot.lane.b32.xlu0 %v111_v9, %s141_s7  ;;  %61 = vrot.lane.b32.xlu1 %v112_v10, %s142_s8 }
  0x16   :  { %67 = vrot.lane.b32.xlu0 %v113_v11, %s143_s13  ;;  %73 = vrot.lane.b32.xlu1 %v114_v12, %s144_s14 }
  0x1a   :  { %79 = vrot.lane.b32.xlu0 %v115_v13, %s145_s19  ;;  %85 = vrot.lane.b32.xlu1 %v116_v14, %s146_s20 }
  0x1e   :  { %91 = vrot.lane.b32.xlu0 %v117_v15, %s147_s0 }
  0x74   :  { %v8_v16 = vpop.permute.xlu0 %7   ;;  %v20_v17 = vpop.permute.xlu1 %19  }
  0x75   :  { %10 = vst.msk [vmem:[#allocation0] sm:$0x1] %vm9_vm1, %v8_v16  }
  0x78   :  { %v14_v18 = vpop.permute.xlu0 %13   ;;  %v26_v19 = vpop.permute.xlu1 %25  }
  0x79   :  { %16 = vst.msk [vmem:[#allocation0] sm:$0x1] %vm15_vm2, %v14_v18  }
  0x7a   :  { %22 = vst.msk [vmem:[#allocation0] sm:$0x1] %vm21_vm3, %v20_v17  }
  0x7b   :  { %28 = vst.msk [vmem:[#allocation0] sm:$0x1] %vm27_vm4, %v26_v19  }
  0x7c   :  { %v32_v20 = vpop.permute.xlu0 %31   ;;  %v38_v21 = vpop.permute.xlu1 %37  }
  0x7d   :  { %34 = vst.msk [vmem:[#allocation0] sm:$0x1] %vm33_vm5, %v32_v20  }
  0x7e   :  { %40 = vst.msk [vmem:[#allocation0] sm:$0x1] %vm39_vm6, %v38_v21  }
  0x80   :  { %v44_v22 = vpop.permute.xlu0 %43   ;;  %v50_v23 = vpop.permute.xlu1 %49  }
  0x81   :  { %46 = vst.msk [vmem:[#allocation0] sm:$0x1] %vm45_vm7, %v44_v22  }
  0x82   :  { %52 = vst.msk [vmem:[#allocation0] sm:$0x1] %vm51_vm8, %v50_v23  }
  0x84   :  { %v56_v24 = vpop.permute.xlu0 %55   ;;  %v62_v25 = vpop.permute.xlu1 %61  }
  0x85   :  { %58 = vst.msk [vmem:[#allocation0] sm:$0x1] %vm57_vm9, %v56_v24  }
  0x86   :  { %64 = vst.msk [vmem:[#allocation0] sm:$0x1] %vm63_vm10, %v62_v25  }
  0x88   :  { %v68_v26 = vpop.permute.xlu0 %67   ;;  %v74_v27 = vpop.permute.xlu1 %73  }
  0x89   :  { %70 = vst.msk [vmem:[#allocation0] sm:$0x1] %vm69_vm11, %v68_v26  }
  0x8a   :  { %76 = vst.msk [vmem:[#allocation0] sm:$0x1] %vm75_vm12, %v74_v27  }
  0x8c   :  { %v80_v28 = vpop.permute.xlu0 %79   ;;  %v86_v29 = vpop.permute.xlu1 %85  }
  0x8d   :  { %82 = vst.msk [vmem:[#allocation0] sm:$0x1] %vm81_vm13, %v80_v28  }
  0x8e   :  { %88 = vst.msk [vmem:[#allocation0] sm:$0x1] %vm87_vm14, %v86_v29  }
  0x90   :  { %v92_v30 = vpop.permute.xlu0 %91  }
  0x91   :  { %94 = vst.msk [vmem:[#allocation0] sm:$0x1] %vm93_vm15, %v92_v30  }
  0x98   :  { %v99_v31 = vld [vmem:[#allocation0] sm:$0x1] }
  0x99   :  { %102 = vst [vmem:[%s210_s1] sm:$0x1] %v99_v31 }

// kernel: conv_block.1
= control target key start
LH: loop header
LB: loop body
LE: loop exit
PB: predicated region body
PF: predicated region fallthrough
CT: control target
= control target key end

     0   :  { %s1254_s24 = smov 0   ;;  %s1486_s0 = inlined_call_operand.vmem [shape: f32[2,16,128], index: 0, kind: input, shape index: {}]   ;;  %s1487_s1 = inlined_call_operand.vmem [shape: f32[1,128], index: 1, kind: input, shape index: {}]   ;;  %s1488_s2 = inlined_call_operand.vmem [shape: f32[1,128], index: 2, kind: input, shape index: {}]   ;;  %s1489_s3 = inlined_call_operand.vmem [shape: bf16[384,128], index: 3, kind: input, shape index: {}]   ;;  %s1490_s4 = inlined_call_operand.vmem [shape: f32[1,128], index: 4, kind: input, shape index: {}]   ;;  %s1491_s5 = inlined_call_operand.vmem [shape: f32[1,128], index: 5, kind: input, shape index: {}]   ;;  %s1492_s6 = inlined_call_operand.vmem [shape: bf16[384,128], index: 6, kind: input, shape index: {}]   ;;  %s1493_s7 = inlined_call_operand.vmem [shape: f32[2,16,128], index: 7, kind: output, shape index: {}]  }
   0x1 LB: > { %s963_s25 = sadd.s32 4294967295, %s1209_s24   ;;  %p967_p0 = scmp.ge.s32.totalorder %s1209_s24, 1  ;;  %s1209_s24 = sphi %s1254_s24, %s17_s24  }
   0x2   : > { %p237_p1 = scmp.lt.s32.totalorder %s1209_s24, 3 }
   0x4   : > { %p238_p2 = pnand %p967_p0, %p237_p1 }
   0x5   : > { %p269_p3 = scmp.lt.s32.totalorder (!%p238_p2), %s963_s25, 1 }
   0x6   : > { %241 = sbr.rel (%p238_p2) target bundleno = 465 (0x1d1), region = 48 }
   0xb   : > { %v1155_v0 = vld [vmem:[%s1489_s3 + $0x78] sm:$0xff]   ;;  %v1211_v1 = vmov 0.0   ;;  %vm1212_vm0 = vmmov 0   ;;  %v1158_v4 = vld [vmem:[%s1489_s3 + $0x70] sm:$0xff]   ;;  %v1161_v7 = vld [vmem:[%s1489_s3 + $0x68] sm:$0xff]   ;;  %s1501_s25 = smov (!%p269_p3, %s963_s25), 1 }
   0xc   : > { %1104 = vmatprep.subr.bf16.mxu1 %v1211_v1  ;;  %v1156_v2 = vld [vmem:[%s1489_s3 + $0xb8] sm:$0xff]   ;;  %1042 = vmatprep.subr.bf16.mxu0 %v1155_v0  ;;  %v1159_v5 = vld [vmem:[%s1489_s3 + $0xb0] sm:$0xff]   ;;  %v1162_v8 = vld [vmem:[%s1489_s3 + $0xa8] sm:$0xff]   ;;  %s1040_s14 = sshll.u32 %s1501_s25, 4  ;;  %vm302_vm1 = vcmask 1040384   ;;  %vm309_vm3 = vcmask 1046528  }
   0xd   : > { %v1157_v3 = vld [vmem:[%s1489_s3 + $0x38] sm:$0xff]   ;;  %1120 = vmatprep.mubr.msk.bf16.mxu1 %vm1212_vm0, %v1211_v1  ;;  %1105 = vmatpush3.bf16.msra.mxu1 %v1156_v2  ;;  %v1160_v6 = vld [vmem:[%s1489_s3 + $0x30] sm:$0xff]   ;;  %v1163_v9 = vld [vmem:[%s1489_s3 + $0x28] sm:$0xff]   ;;  %s273_s23 = scalar_lea.vmem %s1486_s0, %s1040_s14  ;;  %vm1213_vm4 = vmmov 1   ;;  %s278_s11 = scalar_lea.vmem %s1493_s7, %s1040_s14 }
   0xe   : > { %1043 = vmatpush3.bf16.msra.mxu0 %v1157_v3  ;;  %1106 = vmatprep.subr.bf16.mxu1 %v1211_v1  ;;  %v1164_v10 = vld [vmem:[%s1489_s3 + $0x60] sm:$0xff]   ;;  %v1167_v13 = vld [vmem:[%s1489_s3 + $0x58] sm:$0xff]   ;;  %v1170_v16 = vld [vmem:[%s1489_s3 + $0x50] sm:$0xff]  }
   0xf   : > { %1044 = vmatprep.subr.bf16.mxu0 %v1158_v4  ;;  %v1165_v11 = vld [vmem:[%s1489_s3 + $0xa0] sm:$0xff]   ;;  %v1168_v14 = vld [vmem:[%s1489_s3 + $0x98] sm:$0xff]   ;;  %v1171_v17 = vld [vmem:[%s1489_s3 + $0x90] sm:$0xff]  }
  0x10   : > { %v1166_v12 = vld [vmem:[%s1489_s3 + $0x20] sm:$0xff]   ;;  %v1169_v15 = vld [vmem:[%s1489_s3 + $0x18] sm:$0xff]   ;;  %v1172_v18 = vld [vmem:[%s1489_s3 + $0x10] sm:$0xff]  }
  0x11   : > { %1107 = vmatpush3.bf16.msra.mxu1 %v1159_v5  ;;  %v1173_v19 = vld [vmem:[%s1489_s3 + $0x48] sm:$0xff]   ;;  %v280_v22 = vld [vmem:[%s273_s23] sm:$0xff]  ;;  %vm1359_vm2 = vmneg %vm302_vm1 }
  0x12   : > { %1045 = vmatpush3.bf16.msra.mxu0 %v1160_v6  ;;  %1108 = vmatprep.subr.bf16.mxu1 %v1211_v1  ;;  %v1174_v20 = vld [vmem:[%s1489_s3 + $0x88] sm:$0xff]   ;;  %v972_v24 = vld [vmem:[%s1487_s1] ss:$0 sm:$0xff]  ;;  %vm1368_vm5 = vmpackc.low %vm309_vm3, %vm1213_vm4 }
  0x13   : > { %1046 = vmatprep.subr.bf16.mxu0 %v1161_v7  ;;  %v1175_v21 = vld [vmem:[%s1489_s3 + $0x8] sm:$0xff]   ;;  %v1176_v25 = vld [vmem:[%s1489_s3 + $0x40] sm:$0xff]   ;;  %v289_v26 = vmul.f32 %v972_v24, %v280_v22  ;;  %vm1374_vm6 = vmpackc.low %vm1213_vm4, %vm1359_vm2 }
  0x14   : > { %v281_v23 = vld [vmem:[%s273_s23 + $0x8] sm:$0xff]  ;;  %v973_v28 = vld [vmem:[%s1488_s2] ss:$0 sm:$0xff]  ;;  %v1179_v40 = vld [vmem:[%s1492_s6 + $0x78] sm:$0xff]  }
  0x15   : > { %1109 = vmatpush3.bf16.msra.mxu1 %v1162_v8  ;;  %v290_v27 = vmul.f32 %v972_v24, %v281_v23  ;;  %v1177_v29 = vld [vmem:[%s1489_s3 + $0x80] sm:$0xff]   ;;  %v298_v32 = vadd.f32 %v973_v28, %v289_v26  ;;  %v1180_v42 = vld [vmem:[%s1492_s6 + $0x38] sm:$0xff]   ;;  %v1182_v48 = vld [vmem:[%s1492_s6 + $0x70] sm:$0xff]  }
  0x16   : > { %1047 = vmatpush3.bf16.msra.mxu0 %v1163_v9  ;;  %1110 = vmatprep.subr.bf16.mxu1 %v1211_v1  ;;  %v1178_v31 = vld [vmem:[%s1489_s3] sm:$0xff]   ;;  %v1181_v45 = vld [vmem:[%s1492_s6 + $0xb8] sm:$0xff]   ;;  %v1184_v49 = vld [vmem:[%s1492_s6 + $0xb0] sm:$0xff]  }
  0x17   : > { %1048 = vmatprep.subr.bf16.mxu0 %v1164_v10  ;;  %v299_v33 = vadd.f32 %v973_v28, %v290_v27  ;;  %v303_v35 = vrot.slane %v298_v32, 7  ;;  %v310_v37 = vrot.slane %v298_v32, 1  ;;  %v1183_v50 = vld [vmem:[%s1492_s6 + $0x30] sm:$0xff]   ;;  %v1185_v51 = vld [vmem:[%s1492_s6 + $0x68] sm:$0xff]   ;;  %v1188_v54 = vld [vmem:[%s1492_s6 + $0x60] sm:$0xff]  }
  0x18   : > { %v1186_v52 = vld [vmem:[%s1492_s6 + $0x28] sm:$0xff]   ;;  %v1189_v55 = vld [vmem:[%s1492_s6 + $0x20] sm:$0xff]   ;;  %v1191_v57 = vld [vmem:[%s1492_s6 + $0x58] sm:$0xff]  }
  0x19   : > { %1111 = vmatpush3.bf16.msra.mxu1 %v1165_v11  ;;  %v304_v36 = vrot.slane %v299_v33, 7  ;;  %v311_v38 = vrot.slane %v299_v33, 1  ;;  %v317_v41 = vpack.c.bf16 %v299_v33, %v298_v32  ;;  %v1187_v53 = vld [vmem:[%s1492_s6 + $0xa8] sm:$0xff]   ;;  %v1190_v56 = vld [vmem:[%s1492_s6 + $0xa0] sm:$0xff]   ;;  %v1192_v58 = vld [vmem:[%s1492_s6 + $0x18] sm:$0xff]  }
  0x1a   : > { %1049 = vmatpush3.bf16.msra.mxu0 %v1166_v12  ;;  %1112 = vmatprep.subr.bf16.mxu1 %v1211_v1  ;;  %v1193_v59 = vld [vmem:[%s1492_s6 + $0x98] sm:$0xff]   ;;  %v1194_v60 = vld [vmem:[%s1492_s6 + $0x50] sm:$0xff]   ;;  %v1197_v63 = vld [vmem:[%s1492_s6 + $0x48] sm:$0xff]  }
  0x1b   : > { %1050 = vmatprep.subr.bf16.mxu0 %v1167_v13  ;;  %v312_v43 = vsel %vm309_vm3, %v310_v37, %v311_v38  ;;  %v305_v44 = vsel %vm302_vm1, %v303_v35, %v304_v36  ;;  %543 = vmatprep.mubr.bf16.mxu0 %v317_v41  ;;  %v1195_v61 = vld [vmem:[%s1492_s6 + $0x10] sm:$0xff]   ;;  %v1198_v0 = vld [vmem:[%s1492_s6 + $0x8] sm:$0xff]   ;;  %v1200_v3 = vld [vmem:[%s1492_s6 + $0x40] sm:$0xff]  }
  0x1c   : > { %v1003_v46 = vpack.c.bf16 %v311_v38, %v312_v43  ;;  %v1000_v47 = vpack.c.bf16 %v305_v44, %v303_v35  ;;  %v1196_v62 = vld [vmem:[%s1492_s6 + $0x90] sm:$0xff]   ;;  %v1199_v2 = vld [vmem:[%s1492_s6 + $0x88] sm:$0xff]   ;;  %v1201_v4 = vld [vmem:[%s1492_s6] sm:$0xff]  }
  0x1d   : > { %1113 = vmatpush3.bf16.msra.mxu1 %v1168_v14  ;;  %v1202_v5 = vld [vmem:[%s1492_s6 + $0x80] sm:$0xff]  }
  0x1e   : > { %1051 = vmatpush3.bf16.msra.mxu0 %v1169_v15  ;;  %1114 = vmatprep.subr.bf16.mxu1 %v1211_v1  ;;  %v1005_v14 = vld [vmem:[%s1490_s4] ss:$0 sm:$0xff] }
  0x1f   : > { %1052 = vmatprep.subr.bf16.mxu0 %v1170_v16 }
  0x21   : > { %1115 = vmatpush3.bf16.msra.mxu1 %v1171_v17 }
  0x22   : > { %1053 = vmatpush3.bf16.msra.mxu0 %v1172_v18  ;;  %1116 = vmatprep.subr.bf16.mxu1 %v1211_v1 }
  0x23   : > { %1054 = vmatprep.subr.bf16.mxu0 %v1173_v19  ;;  %v1006_v19 = vld [vmem:[%s1491_s5] ss:$0 sm:$0xff] }
  0x25   : > { %1117 = vmatpush3.bf16.msra.mxu1 %v1174_v20 }
  0x26   : > { %1055 = vmatpush3.bf16.msra.mxu0 %v1175_v21  ;;  %1118 = vmatprep.subr.bf16.mxu1 %v1211_v1 }
  0x27   : > { %1056 = vmatprep.subr.bf16.mxu0 %v1176_v25 }
  0x29   : > { %1119 = vmatpush3.bf16.msra.mxu1 %v1177_v29 }
  0x2a   : > { %1057 = vmatpush3.bf16.msra.mxu0 %v1178_v31  ;;  %1124 = vmatprep.subr.bf16.mxu1 %v1211_v1 }
  0x2b   : > { %1073 = vmatprep.subr.bf16.mxu0 %v1179_v40 }
  0x2c   : > { %1121 = vmatmul.mubr.msk.bf16.vlgmr.msra.gmra.mxu1 %vm1368_vm5, %v1003_v46 }
  0x2d   : > { %1001 = vmatmul.mubr.msk.bf16.vlgmr.msra.gmra.mxu0 %vm1374_vm6, %v1000_v47  ;;  %1125 = vmatpush3.bf16.msra.mxu1 %v1181_v45 }
  0x2e   : > { %1074 = vmatpush3.bf16.msra.mxu0 %v1180_v42  ;;  %1126 = vmatprep.subr.bf16.mxu1 %v1211_v1 }
  0x2f   : > { %1075 = vmatprep.subr.bf16.mxu0 %v1182_v48  ;;  %1140 = vmatprep.mubr.msk.bf16.mxu1 %vm1212_vm0, %v1211_v1 }
  0x31   : > { %1127 = vmatpush3.bf16.msra.mxu1 %v1184_v49 }
  0x32   : > { %1076 = vmatpush3.bf16.msra.mxu0 %v1183_v50  ;;  %1128 = vmatprep.subr.bf16.mxu1 %v1211_v1 }
  0x33   : > { %1077 = vmatprep.subr.bf16.mxu0 %v1185_v51 }
  0x35   : > { %1129 = vmatpush3.bf16.msra.mxu1 %v1187_v53 }
  0x36   : > { %1078 = vmatpush3.bf16.msra.mxu0 %v1186_v52  ;;  %1130 = vmatprep.subr.bf16.mxu1 %v1211_v1 }
  0x37   : > { %1079 = vmatprep.subr.bf16.mxu0 %v1188_v54 }
  0x39   : > { %1131 = vmatpush3.bf16.msra.mxu1 %v1190_v56 }
  0x3a   : > { %1080 = vmatpush3.bf16.msra.mxu0 %v1189_v55  ;;  %1132 = vmatprep.subr.bf16.mxu1 %v1211_v1 }
  0x3b   : > { %1081 = vmatprep.subr.bf16.mxu0 %v1191_v57 }
  0x3d   : > { %1133 = vmatpush3.bf16.msra.mxu1 %v1193_v59 }
  0x3e   : > { %1082 = vmatpush3.bf16.msra.mxu0 %v1192_v58  ;;  %1134 = vmatprep.subr.bf16.mxu1 %v1211_v1 }
  0x3f   : > { %1083 = vmatprep.subr.bf16.mxu0 %v1194_v60 }
  0x41   : > { %1135 = vmatpush3.bf16.msra.mxu1 %v1196_v62 }
  0x42   : > { %1084 = vmatpush3.bf16.msra.mxu0 %v1195_v61  ;;  %1136 = vmatprep.subr.bf16.mxu1 %v1211_v1 }
  0x43   : > { %1085 = vmatprep.subr.bf16.mxu0 %v1197_v63 }
  0x45   : > { %1137 = vmatpush3.bf16.msra.mxu1 %v1199_v2 }
  0x46   : > { %1086 = vmatpush3.bf16.msra.mxu0 %v1198_v0  ;;  %1138 = vmatprep.subr.bf16.mxu1 %v1211_v1 }
  0x47   : > { %1087 = vmatprep.subr.bf16.mxu0 %v1200_v3 }
  0x49   : > { %1139 = vmatpush3.bf16.msra.mxu1 %v1202_v5 }
  0x4a   : > { %1088 = vmatpush3.bf16.msra.mxu0 %v1201_v4 }
  0xec   : > { %v586_v6 = vpop.f32.mrf.mxu1 }
  0xed   : > { %v1058_v7 = vpop.f32.mrf.mxu0 }
  0xee   : > { %v1122_v8 = vpop.f32.mrf.mxu1 }
  0xef   : > { %v1059_v9 = vpop.f32.mrf.mxu0 }
  0xf0   : > { %v1060_v10 = vadd.f32 %v1059_v9, %v1058_v7  ;;  %v589_v11 = vpop.f32.mrf.mxu1 }
  0xf1   : > { %v1061_v12 = vpop.f32.mrf.mxu0 }
  0xf2   : > { %v587_v13 = vadd.f32 %v1060_v10, %v586_v6  ;;  %v1123_v1 = vpop.f32.mrf.mxu1 }
  0xf3   : > { %v1062_v15 = vpop.f32.mrf.mxu0 }
  0xf4   : > { %v593_v16 = vmax.f32 %v587_v13, 0.0  ;;  %v1063_v17 = vadd.f32 %v1062_v15, %v1061_v12 }
  0xf6   : > { %v602_v18 = vmul.f32 %v1005_v14, %v593_v16  ;;  %v590_v20 = vadd.f32 %v1063_v17, %v589_v11 }
  0xf8   : > { %v594_v21 = vmax.f32 %v590_v20, 0.0  ;;  %v611_v22 = vadd.f32 %v1006_v19, %v602_v18 }
  0xfa   : > { %v603_v23 = vmul.f32 %v1005_v14, %v594_v21  ;;  %v615_v25 = vrot.slane %v611_v22, 7  ;;  %v621_v26 = vrot.slane %v611_v22, 1 }
  0xfc   : > { %v612_v24 = vadd.f32 %v1006_v19, %v603_v23 }
  0xfe   : > { %v616_v27 = vrot.slane %v612_v24, 7  ;;  %v622_v28 = vrot.slane %v612_v24, 1  ;;  %v628_v29 = vpack.c.bf16 %v612_v24, %v611_v22 }
 0x100   : > { %854 = vmatprep.mubr.bf16.mxu0 %v628_v29  ;;  %v617_v30 = vsel %vm302_vm1, %v615_v25, %v616_v27  ;;  %v623_v31 = vsel %vm309_vm3, %v621_v26, %v622_v28 }
 0x101   : > { %v1033_v32 = vpack.c.bf16 %v617_v30, %v615_v25  ;;  %v1036_v33 = vpack.c.bf16 %v622_v28, %v623_v31 }
 0x103   : > { %1034 = vmatmul.mubr.msk.bf16.vlgmr.msra.gmra.mxu0 %vm1374_vm6, %v1033_v32  ;;  %1141 = vmatmul.mubr.msk.bf16.vlgmr.msra.gmra.mxu1 %vm1368_vm5, %v1036_v33 }
 0x1c3   : > { %v1089_v35 = vpop.f32.mrf.mxu0  ;;  %v897_v36 = vpop.f32.mrf.mxu1 }
 0x1c5   : > { %v1090_v37 = vpop.f32.mrf.mxu0  ;;  %v1142_v38 = vpop.f32.mrf.mxu1 }
 0x1c6   : > { %v1091_v40 = vadd.f32 %v1090_v37, %v1089_v35 }
 0x1c7   : > { %v1092_v41 = vpop.f32.mrf.mxu0  ;;  %v900_v42 = vpop.f32.mrf.mxu1 }
 0x1c8   : > { %v898_v43 = vadd.f32 %v1091_v40, %v897_v36 }
 0x1c9   : > { %v1093_v44 = vpop.f32.mrf.mxu0  ;;  %v1143_v45 = vpop.f32.mrf.mxu1 }
 0x1ca   : > { %v904_v39 = vmax.f32 %v898_v43, 0.0  ;;  %v1094_v46 = vadd.f32 %v1093_v44, %v1092_v41 }
 0x1cc   : > { %906 = vst [vmem:[%s278_s11] sm:$0xff] %v904_v39  ;;  %v901_v34 = vadd.f32 %v1094_v46, %v900_v42 }
 0x1ce   : > { %v905_v47 = vmax.f32 %v901_v34, 0.0 }
 0x1d0   : > { %907 = vst [vmem:[%s278_s11 + $0x8] sm:$0xff] %v905_v47 }
 0x1d1 PF: > { %s17_s24 = sadd.s32 1, %s1209_s24  }
 0x1d2   : > { %p14_p4 = scmp.ge.s32.totalorder %s17_s24, 4  }
 0x1d4   :  { %16 = sbr.rel (!%p14_p4) target bundleno = 1 (0x1), region = 78 }

</bundles_post_ra>
